<compile_context>
chip_gen: v7x
topology: tpu7x:2x2x1
jax: 0.10.0
libtpu: 0.0.40
codegen_flags: <defaults>
</compile_context>

<pallas_src>
import jax
import jax.numpy as jnp
from jax import lax
from jax.experimental import pallas as pl
from jax.experimental.pallas import tpu as pltpu

_BN_EPS = 1e-5  # nn.BatchNorm1d default

_LANE_TILES = (1024, 512, 256, 128)
_SUBLANE_TILES = (512, 256, 128, 64, 32, 16, 8)


# ---------------------------------------------------------------------------
# Kernels
# ---------------------------------------------------------------------------

def _linear_kernel_f32out(x_ref, w_ref, b_ref, o_ref):
    """y = x @ W^T + b, f32 output: accumulate directly into the resident
    output block (no separate scratch)."""
    k = pl.program_id(2)

    @pl.when(k == 0)
    def _():
        o_ref[...] = jnp.broadcast_to(b_ref[...].astype(jnp.float32),
                                      o_ref.shape)

    o_ref[...] += jnp.dot(x_ref[...], w_ref[...],
                          preferred_element_type=jnp.float32)


def _linear_kernel_acc(x_ref, w_ref, b_ref, o_ref, acc_ref):
    """y = x @ W^T + b for narrow output dtypes: f32 scratch accumulator,
    single cast+store on the last K step."""
    k = pl.program_id(2)

    @pl.when(k == 0)
    def _():
        acc_ref[...] = jnp.zeros_like(acc_ref)

    acc_ref[...] += jnp.dot(x_ref[...], w_ref[...],
                            preferred_element_type=jnp.float32)

    @pl.when(k == pl.num_programs(2) - 1)
    def _():
        o_ref[...] = (acc_ref[...]
                      + b_ref[...].astype(jnp.float32)).astype(o_ref.dtype)


def _make_linear_stats_kernel(n_valid, tm):
    """BN pass 1: tiled y = x @ W^T + b plus per-column sum / sum-of-squares.
    Grid order is (j, i, k) so the (1, tn) stats blocks stay VMEM-resident
    across the whole batch sweep for a given column block.  Rows >= n_valid
    (batch padding) are masked out of the statistics."""

    def kernel(x_ref, w_ref, b_ref, y_ref, s_ref, ss_ref, acc_ref):
        i = pl.program_id(1)
        k = pl.program_id(2)

        @pl.when(jnp.logical_and(i == 0, k == 0))
        def _():
            s_ref[...] = jnp.zeros_like(s_ref)
            ss_ref[...] = jnp.zeros_like(ss_ref)

        @pl.when(k == 0)
        def _():
            acc_ref[...] = jnp.zeros_like(acc_ref)

        acc_ref[...] += jnp.dot(x_ref[...], w_ref[...],
                                preferred_element_type=jnp.float32)

        @pl.when(k == pl.num_programs(2) - 1)
        def _():
            y = acc_ref[...] + b_ref[...].astype(jnp.float32)
            y_ref[...] = y.astype(y_ref.dtype)
            # Mask padded batch rows so BN stats use the true batch only
            # (padded x rows produce y == bias, which must not contribute).
            row = i * tm + lax.broadcasted_iota(jnp.int32, (tm, 1), 0)
            ym = jnp.where(row < n_valid, y, 0.0)
            s_ref[...] += jnp.sum(ym, axis=0, keepdims=True)
            ss_ref[...] += jnp.sum(ym * ym, axis=0, keepdims=True)

    return kernel


def _scale_shift_kernel(y_ref, scale_ref, shift_ref, o_ref):
    """BN pass 2: out = y * scale + shift (per-column scale/shift)."""
    o_ref[...] = (y_ref[...].astype(jnp.float32) * scale_ref[...]
                  + shift_ref[...]).astype(o_ref.dtype)


# ---------------------------------------------------------------------------
# Wrapper
# ---------------------------------------------------------------------------

def _round_up(v, m):
    return -(-v // m) * m


def _pad2(a, rows, cols):
    pr, pc = rows - a.shape[0], cols - a.shape[1]
    if pr == 0 and pc == 0:
        return a
    return jnp.pad(a, ((0, pr), (0, pc)))


def _pick_tile(dim_padded, candidates, max_tile, prefer_multi=False):
    """Largest candidate <= max_tile dividing dim_padded; with prefer_multi,
    prefer the largest one that still yields >= 2 blocks (v7x megacore)."""
    divs = [c for c in candidates if c <= max_tile and dim_padded % c == 0]
    if not divs:
        return dim_padded
    if prefer_multi:
        for c in divs:
            if dim_padded // c >= 2:
                return c
    return divs[0]


def reset_linear_forward(x, weight, bias, bn_weight, bn_bias, *,
                         rescale=False, tm=512, tn=512, tk=None,
                         vmem_limit_bytes=48 * 1024 * 1024):
    """x: (N, Cin), weight: (H, Cin), bias/bn_weight/bn_bias: (H,)."""
    N, Cin = x.shape
    H, Cin_w = weight.shape
    assert Cin == Cin_w
    out_dtype = x.dtype
    itemsize = jnp.dtype(out_dtype).itemsize

    if tk is None:
        tk = 1024 if Cin >= 1024 else 512

    # Lane dims padded to multiples of 128 (always lane-dense / unmasked
    # stores); batch padded to a multiple of 8, bumped to 128 only if the
    # divisor-based tile would otherwise be tiny.
    Hp = _round_up(H, 128)
    Kp = _round_up(Cin, 128)
    Mp = _round_up(N, 8)

    tk_ = _pick_tile(Kp, _LANE_TILES, tk)
    tm_ = _pick_tile(Mp, _SUBLANE_TILES, tm)
    if tm_ < 128 and N > 128:
        Mp = _round_up(N, 128)
        tm_ = _pick_tile(Mp, _SUBLANE_TILES, tm)

    # Weight transposed ONCE in the wrapper -> kernel does a plain A @ B on
    # the MXU, no per-tile transpose.
    wt_p = _pad2(weight.T, Kp, Hp)               # (Kp, Hp)
    b2 = _pad2(bias.reshape(1, H), 1, Hp)        # (1, Hp)
    x_p = _pad2(x, Mp, Kp)                       # no-op when already aligned

    if rescale:
        # -------- Fused-stats pass 1: tiled matmul + per-column sum/sumsq --
        tn_ = _pick_tile(Hp, _LANE_TILES, tn, prefer_multi=True)
        cost1 = pl.CostEstimate(
            flops=2 * Mp * Kp * Hp + 3 * Mp * Hp,
            transcendentals=0,
            bytes_accessed=(x_p.size * x_p.dtype.itemsize
                            + wt_p.size * wt_p.dtype.itemsize
                            + Mp * Hp * itemsize + 2 * Hp * 4))
        y, csum, csumsq = pl.pallas_call(
            _make_linear_stats_kernel(N, tm_),
            out_shape=(jax.ShapeDtypeStruct((Mp, Hp), out_dtype),
                       jax.ShapeDtypeStruct((1, Hp), jnp.float32),
                       jax.ShapeDtypeStruct((1, Hp), jnp.float32)),
            grid_spec=pltpu.PrefetchScalarGridSpec(
                num_scalar_prefetch=0,
                # j outermost so the stats blocks stay resident across (i, k).
                grid=(Hp // tn_, Mp // tm_, Kp // tk_),
                in_specs=[
                    pl.BlockSpec((tm_, tk_), lambda j, i, k: (i, k)),
                    pl.BlockSpec((tk_, tn_), lambda j, i, k: (k, j)),
                    pl.BlockSpec((1, tn_), lambda j, i, k: (0, j)),
                ],
                out_specs=(pl.BlockSpec((tm_, tn_), lambda j, i, k: (i, j)),
                           pl.BlockSpec((1, tn_), lambda j, i, k: (0, j)),
                           pl.BlockSpec((1, tn_), lambda j, i, k: (0, j))),
                scratch_shapes=[pltpu.VMEM((tm_, tn_), jnp.float32)]),
            compiler_params=pltpu.CompilerParams(
                dimension_semantics=("parallel", "arbitrary", "arbitrary"),
                vmem_limit_bytes=vmem_limit_bytes),
            cost_estimate=cost1,
        )(x_p, wt_p, b2)

        # Tiny (1, Hp) stats math stays in XLA.  Single-pass variance with a
        # non-negativity guard (f32 accumulation mitigates cancellation).
        inv_n = 1.0 / N
        mean = csum * inv_n
        var = jnp.maximum(csumsq * inv_n - mean * mean, 0.0)
        inv_std = lax.rsqrt(var + _BN_EPS)
        g2 = _pad2(bn_weight.reshape(1, H).astype(jnp.float32), 1, Hp)
        be2 = _pad2(bn_bias.reshape(1, H).astype(jnp.float32), 1, Hp)
        scale = g2 * inv_std
        shift = be2 - mean * scale

        # -------- Pass 2: tiled normalize (out = y * scale + shift) --------
        cost2 = pl.CostEstimate(
            flops=2 * Mp * Hp,
            transcendentals=0,
            bytes_accessed=2 * Mp * Hp * itemsize + 2 * Hp * 4)
        out = pl.pallas_call(
            _scale_shift_kernel,
            out_shape=jax.ShapeDtypeStruct((Mp, Hp), out_dtype),
            grid_spec=pltpu.PrefetchScalarGridSpec(
                num_scalar_prefetch=0,
                grid=(Mp // tm_, Hp // tn_),
                in_specs=[
                    pl.BlockSpec((tm_, tn_), lambda i, j: (i, j)),
                    pl.BlockSpec((1, tn_), lambda i, j: (0, j)),
                    pl.BlockSpec((1, tn_), lambda i, j: (0, j)),
                ],
                out_specs=pl.BlockSpec((tm_, tn_), lambda i, j: (i, j))),
            compiler_params=pltpu.CompilerParams(
                dimension_semantics=("parallel", "parallel"),
                vmem_limit_bytes=vmem_limit_bytes),
            cost_estimate=cost2,
        )(y, scale, shift)
        return out[:N, :H]

    # ------------------ rescale=False: plain tiled linear -------------------
    prefer = (Mp // tm_) < 2   # keep >=2 blocks on a parallel axis (v7x)
    tn_ = _pick_tile(Hp, _LANE_TILES, tn, prefer_multi=prefer)
    cost = pl.CostEstimate(
        flops=2 * Mp * Kp * Hp,
        transcendentals=0,
        bytes_accessed=(x_p.size * x_p.dtype.itemsize
                        + wt_p.size * wt_p.dtype.itemsize
                        + Mp * Hp * itemsize))

    if jnp.dtype(out_dtype) == jnp.dtype(jnp.float32):
        kernel = _linear_kernel_f32out
        scratch = []
    else:
        kernel = _linear_kernel_acc
        scratch = [pltpu.VMEM((tm_, tn_), jnp.float32)]

    out = pl.pallas_call(
        kernel,
        out_shape=jax.ShapeDtypeStruct((Mp, Hp), out_dtype),
        grid_spec=pltpu.PrefetchScalarGridSpec(
            num_scalar_prefetch=0,
            grid=(Mp // tm_, Hp // tn_, Kp // tk_),
            in_specs=[
                pl.BlockSpec((tm_, tk_), lambda i, j, k: (i, k)),
                pl.BlockSpec((tk_, tn_), lambda i, j, k: (k, j)),
                pl.BlockSpec((1, tn_), lambda i, j, k: (0, j)),
            ],
            out_specs=pl.BlockSpec((tm_, tn_), lambda i, j, k: (i, j)),
            scratch_shapes=scratch),
        compiler_params=pltpu.CompilerParams(
            dimension_semantics=("parallel", "parallel", "arbitrary"),
            vmem_limit_bytes=vmem_limit_bytes),
        cost_estimate=cost,
    )(x_p, wt_p, b2)
    return out[:N, :H]


if __name__ == "__main__":
    key = jax.random.PRNGKey(0)
    kx, kw, kb, km, kv = jax.random.split(key, 5)

    N, Cin, H = 8, 128, 128        # small, lane-dense test shapes
    x = jax.random.normal(kx, (N, Cin), dtype=jnp.float32)
    weight = jax.random.normal(kw, (H, Cin), dtype=jnp.float32) * 0.1
    bias = jax.random.normal(kb, (H,), dtype=jnp.float32) * 0.1

    # set_stats(goal_mean, goal_var): bn.bias = goal_mean, bn.weight = sqrt(var+eps)
    goal_mean = jax.random.normal(km, (H,), dtype=jnp.float32)
    goal_var = jax.nn.softplus(jax.random.normal(kv, (H,), dtype=jnp.float32))
    bn_weight = jnp.sqrt(goal_var + 1e-5)
    bn_bias = goal_mean

    # Default path (rescale=False): raw linear output only.
    out = reset_linear_forward(x, weight, bias, bn_weight, bn_bias,
                               rescale=False)
    jax.block_until_ready(out)
    ref = jnp.dot(x, weight.T, precision=lax.Precision.HIGHEST) + bias
    assert jnp.allclose(out, ref, atol=1e-3, rtol=1e-3), "linear mismatch"

    # Narrow-dtype path exercises the scratch-accumulator kernel.
    out_bf = reset_linear_forward(x.astype(jnp.bfloat16),
                                  weight.astype(jnp.bfloat16),
                                  bias.astype(jnp.bfloat16),
                                  bn_weight, bn_bias, rescale=False)
    jax.block_until_ready(out_bf)
    ref_bf = (jnp.dot(x.astype(jnp.bfloat16), weight.astype(jnp.bfloat16).T,
                      preferred_element_type=jnp.float32)
              + bias.astype(jnp.bfloat16).astype(jnp.float32))
    assert jnp.allclose(out_bf.astype(jnp.float32), ref_bf,
                        atol=5e-2, rtol=5e-2), "bf16 linear mismatch"

    # rescale=True path: two-pass linear + training-mode BatchNorm1d.
    out_bn = reset_linear_forward(x, weight, bias, bn_weight, bn_bias,
                                  rescale=True)
    jax.block_until_ready(out_bn)
    mean = ref.mean(axis=0, keepdims=True)
    var = ref.var(axis=0, keepdims=True)     # biased var, as in BN training
    ref_bn = (ref - mean) / jnp.sqrt(var + 1e-5) * bn_weight + bn_bias
    assert jnp.allclose(out_bn, ref_bn, atol=5e-3, rtol=5e-3), "bn mismatch"

    print("KERNEL_OK")
</pallas_src>

<mosaic_0001>
module attributes {stable_mosaic.version = 11 : i64} {
  func.func @_linear_kernel_f32out(%arg0: i32, %arg1: i32, %arg2: i32, %arg3: memref<8x128xf32, #tpu.memory_space<vmem>>, %arg4: memref<128x128xf32, #tpu.memory_space<vmem>>, %arg5: memref<1x128xf32, #tpu.memory_space<vmem>>, %arg6: memref<8x128xf32, #tpu.memory_space<vmem>>) attributes {dimension_semantics = [#tpu.dimension_semantics<parallel>, #tpu.dimension_semantics<parallel>, #tpu.dimension_semantics<arbitrary>], iteration_bounds = array<i64: 1, 1, 1>, scalar_prefetch = 0 : i64, scratch_operands = 0 : i64, tpu.core_type = #tpu.core_type<tc>, window_params = [{transform_indices = @transform_0, window_bounds = array<i64: 8, 128>}, {transform_indices = @transform_1, window_bounds = array<i64: 128, 128>}, {transform_indices = @transform_2, window_bounds = array<i64: 1, 128>}, {transform_indices = @transform_3, window_bounds = array<i64: 8, 128>}]} {
    %c0_i32 = arith.constant 0 : i32
    %0 = arith.cmpi eq, %arg2, %c0_i32 : i32
    %1 = arith.extui %0 : i1 to i32
    %c0_i32_0 = arith.constant 0 : i32
    %2 = arith.cmpi ne, %1, %c0_i32_0 : i32
    scf.if %2 {
      %c0_8 = arith.constant 0 : index
      %c0_9 = arith.constant 0 : index
      %9 = vector.load %arg5[%c0_8, %c0_9] : memref<1x128xf32, #tpu.memory_space<vmem>>, vector<1x128xf32>
      %10 = vector.shape_cast %9 : vector<1x128xf32> to vector<1x128xf32>
      %11 = vector.broadcast %10 : vector<1x128xf32> to vector<8x128xf32>
      %c0_10 = arith.constant 0 : index
      %c0_11 = arith.constant 0 : index
      %12 = vector.load %arg6[%c0_10, %c0_11] : memref<8x128xf32, #tpu.memory_space<vmem>>, vector<8x128xf32>
      tpu.vector_store %arg6[%c0_10, %c0_11], %11 {strides = array<i32>} : memref<8x128xf32, #tpu.memory_space<vmem>>, vector<8x128xf32>,
    } else {
    }
    %c0 = arith.constant 0 : index
    %c0_1 = arith.constant 0 : index
    %3 = vector.load %arg6[%c0, %c0_1] : memref<8x128xf32, #tpu.memory_space<vmem>>, vector<8x128xf32>
    %c0_2 = arith.constant 0 : index
    %c0_3 = arith.constant 0 : index
    %4 = vector.load %arg3[%c0_2, %c0_3] : memref<8x128xf32, #tpu.memory_space<vmem>>, vector<8x128xf32>
    %c0_4 = arith.constant 0 : index
    %c0_5 = arith.constant 0 : index
    %5 = vector.load %arg4[%c0_4, %c0_5] : memref<128x128xf32, #tpu.memory_space<vmem>>, vector<128x128xf32>
    %cst = arith.constant dense<0.000000e+00> : vector<8x128xf32>
    %6 = tpu.matmul %4, %5, %cst {dimension_numbers = #tpu.dot_dimension_numbers<[1], [0], [0], [1], [0, 0, 1, 1], [], []>} : vector<8x128xf32>, vector<128x128xf32>, vector<8x128xf32> -> vector<8x128xf32>
    %7 = arith.addf %3, %6 : vector<8x128xf32>
    %c0_6 = arith.constant 0 : index
    %c0_7 = arith.constant 0 : index
    %8 = vector.load %arg6[%c0_6, %c0_7] : memref<8x128xf32, #tpu.memory_space<vmem>>, vector<8x128xf32>
    tpu.vector_store %arg6[%c0_6, %c0_7], %7 {strides = array<i32>} : memref<8x128xf32, #tpu.memory_space<vmem>>, vector<8x128xf32>,
    return
  }
  func.func @transform_0(%arg0: i32, %arg1: i32, %arg2: i32) -> (i32, i32) {
    %c0_i32 = arith.constant 0 : i32
    return %arg0, %arg2 : i32, i32
  }
  func.func @transform_1(%arg0: i32, %arg1: i32, %arg2: i32) -> (i32, i32) {
    %c0_i32 = arith.constant 0 : i32
    return %arg2, %arg1 : i32, i32
  }
  func.func @transform_2(%arg0: i32, %arg1: i32, %arg2: i32) -> (i32, i32) {
    %c0_i32 = arith.constant 0 : i32
    %c0_i32_0 = arith.constant 0 : i32
    return %c0_i32, %arg1 : i32, i32
  }
  func.func @transform_3(%arg0: i32, %arg1: i32, %arg2: i32) -> (i32, i32) {
    %c0_i32 = arith.constant 0 : i32
    return %arg0, %arg1 : i32, i32
  }
}

</mosaic_0001>

<bundles_post_ra>
// kernel: tpu_custom_call.1
= control target key start
LH: loop header
LB: loop body
LE: loop exit
PB: predicated region body
PF: predicated region fallthrough
CT: control target
= control target key end

     0   :  { %8 = vsyncpa [#allocation3], 0  ;;  %s390_s0 = inlined_call_operand.hbm [shape: f32[8,128], index: 0, kind: input, shape index: {}]   ;;  %s391_s1 = inlined_call_operand.hbm [shape: f32[128,128], index: 1, kind: input, shape index: {}]   ;;  %s392_s2 = inlined_call_operand.vmem [shape: f32[1,128], index: 2, kind: input, shape index: {}]   ;;  %s393_s3 = inlined_call_operand.hbm [shape: f32[8,128], index: 3, kind: output, shape index: {}]  }
   0x1   :  { %9 = vsyncpa [#allocation6], 0 }
   0x2   :  { %10 = vsyncpa [#allocation4], 0  ;;  %s316_s12 = smov [#allocation2]   ;;  %s317_s14 = smov [#allocation5]  }
   0x3   :  { %s17_s13 = sshll.u32 %s316_s12, 4  ;;  %s26_s15 = sshll.u32 %s317_s14, 4  ;;  %s18_s13 = int_to_ptr.vmem [resolvable:$true] %s17_s13  ;;  %s344_s15 = int_to_ptr.vmem [resolvable:$true] %s26_s15 }
   0x4   :  { %s244_s18 = scalar_lea.hbm %s390_s0, 128 }
   0x5   :  { %p245_p0 = scmp.ne.s32.totalorder %s390_s0, %s244_s18  ;;  %p248_p1 = scmp.lt.u32.totalorder %s244_s18, %s390_s0 }
   0x7   :  { %p250_p2 = pnand %p248_p1, %p245_p0 }
   0x9   :  { %253 = shalt.err (!%p250_p2)
}
   0xa   :  { %s254_s23 = scalar_lea.vmem %s18_s13, 128  ;;  %p259_p4 = scmp.lt.s32.totalorder %s18_s13, %s18_s13 }
   0xb   :  { %p255_p3 = scmp.ne.s32.totalorder %s18_s13, %s254_s23  ;;  %p260_p5 = scmp.lt.s32.totalorder %s254_s23, %s254_s23 }
   0xd   :  { %p261_p6 = por %p260_p5, %p259_p4 }
   0xf   :  { %p262_p7 = pnand %p261_p6, %p255_p3 }
  0x11   :  { %265 = shalt.err (!%p262_p7)
}
  0x12   :  { %20 = dma.hbm_to_vmem [thread:$0]  %s390_s0, 128, %s18_s13, [#allocation3]  }
  0x13   :  { %s266_s28 = scalar_lea.hbm %s391_s1, 2048 }
  0x14   :  { %p267_p8 = scmp.ne.s32.totalorder %s391_s1, %s266_s28  ;;  %p270_p9 = scmp.lt.u32.totalorder %s266_s28, %s391_s1 }
  0x16   :  { %p272_p10 = pnand %p270_p9, %p267_p8 }
  0x18   :  { %275 = shalt.err (!%p272_p10)
}
  0x19   :  { %s276_s6 = scalar_lea.vmem %s344_s15, 2048  ;;  %p281_p12 = scmp.lt.s32.totalorder %s344_s15, %s344_s15 }
  0x1a   :  { %p277_p11 = scmp.ne.s32.totalorder %s344_s15, %s276_s6  ;;  %p282_p13 = scmp.lt.s32.totalorder %s276_s6, %s276_s6 }
  0x1c   :  { %p283_p0 = por %p282_p13, %p281_p12 }
  0x1e   :  { %p284_p1 = pnand %p283_p0, %p277_p11 }
  0x20   :  { %287 = shalt.err (!%p284_p1)
}
  0x21   :  { %s318_s0 = smov 128   ;;  %s319_s7 = smov 8  }
  0x22   :  { %32 = dma.hbm_to_vmem [thread:$0]  %s391_s1, 2048, %s344_s15, [#allocation6], %s318_s0, %s318_s0, %s319_s7  }
  0x23   :  { %310 = dma.done.wait [#allocation3], 128  }
  0x24   :  { %311 = vsyncadd [#allocation3], 4294967168 }
  0x25   :  { %312 = dma.done.wait [#allocation6], 2048  }
  0x26   :  { %313 = vsyncadd [#allocation6], 4294965248  ;;  %v320_v0 = vmov 0.0|0.0   ;;  %vm321_vm0 = vmmov 0   ;;  %v322_v1 = vmov 0.0   ;;  %v55_v2 = vld [vmem:[#allocation5] sm:$0xff] }
  0x27   :  { %212 = vmatprep.subr.bf16.mxu0 %v320_v0  ;;  %209 = vmatprep.mubr.msk.f32.mxu0 %vm321_vm0, %v322_v1  ;;  %v56_v3 = vld [vmem:[#allocation5 + $0x8] sm:$0xff]  ;;  %v57_v4 = vld [vmem:[#allocation5 + $0x10] sm:$0xff]  ;;  %v58_v6 = vld [vmem:[#allocation5 + $0x18] sm:$0xff]  ;;  %s323_s11 = smov [#allocation7]  }
  0x28   :  { %v213_v5 = vpack.c.bf16 %v56_v3, %v55_v2  ;;  %v216_v7 = vpack.c.bf16 %v58_v6, %v57_v4  ;;  %v59_v8 = vld [vmem:[#allocation5 + $0x20] sm:$0xff]  ;;  %v60_v9 = vld [vmem:[#allocation5 + $0x28] sm:$0xff]  ;;  %v61_v11 = vld [vmem:[#allocation5 + $0x30] sm:$0xff]  ;;  %s149_s12 = sshll.u32 %s323_s11, 4  ;;  %s150_s12 = int_to_ptr.vmem [resolvable:$true] %s149_s12 }
  0x29   :  { %v219_v10 = vpack.c.bf16 %v60_v9, %v59_v8  ;;  %v62_v12 = vld [vmem:[#allocation5 + $0x38] sm:$0xff]  ;;  %v63_v14 = vld [vmem:[#allocation5 + $0x40] sm:$0xff]  ;;  %v64_v15 = vld [vmem:[#allocation5 + $0x48] sm:$0xff]  ;;  %s288_s13 = scalar_lea.vmem %s150_s12, 128  ;;  %p293_p3 = scmp.lt.s32.totalorder %s150_s12, %s150_s12 }
  0x2a   :  { %214 = vmatpush3.bf16.msra.mxu0 %v213_v5  ;;  %v222_v13 = vpack.c.bf16 %v62_v12, %v61_v11  ;;  %v225_v16 = vpack.c.bf16 %v64_v15, %v63_v14  ;;  %v65_v17 = vld [vmem:[#allocation5 + $0x50] sm:$0xff]  ;;  %v66_v18 = vld [vmem:[#allocation5 + $0x58] sm:$0xff]  ;;  %v67_v20 = vld [vmem:[#allocation5 + $0x60] sm:$0xff]  ;;  %p289_p2 = scmp.ne.s32.totalorder %s150_s12, %s288_s13  ;;  %p294_p4 = scmp.lt.s32.totalorder %s288_s13, %s288_s13 }
  0x2b   :  { %215 = vmatprep.subr.bf16.mxu0 %v320_v0  ;;  %v228_v19 = vpack.c.bf16 %v66_v18, %v65_v17  ;;  %v68_v21 = vld [vmem:[#allocation5 + $0x68] sm:$0xff]  ;;  %v69_v23 = vld [vmem:[#allocation5 + $0x70] sm:$0xff]  ;;  %v70_v24 = vld [vmem:[#allocation5 + $0x78] sm:$0xff] }
  0x2c   :  { %v231_v22 = vpack.c.bf16 %v68_v21, %v67_v20  ;;  %v234_v25 = vpack.c.bf16 %v70_v24, %v69_v23  ;;  %v54_v26 = vld [vmem:[#allocation2] sm:$0xff]  ;;  %p295_p5 = por %p294_p4, %p293_p3 }
  0x2d   :  { %v159_v27 = vld [vmem:[%s392_s2] ss:$0 sm:$0xff] }
  0x2e   :  { %217 = vmatpush3.bf16.msra.mxu0 %v216_v7  ;;  %p296_p6 = pnand %p295_p5, %p289_p2 }
  0x2f   :  { %218 = vmatprep.subr.bf16.mxu0 %v320_v0 }
  0x32   :  { %220 = vmatpush3.bf16.msra.mxu0 %v219_v10 }
  0x33   :  { %221 = vmatprep.subr.bf16.mxu0 %v320_v0 }
  0x36   :  { %223 = vmatpush3.bf16.msra.mxu0 %v222_v13 }
  0x37   :  { %224 = vmatprep.subr.bf16.mxu0 %v320_v0 }
  0x3a   :  { %226 = vmatpush3.bf16.msra.mxu0 %v225_v16 }
  0x3b   :  { %227 = vmatprep.subr.bf16.mxu0 %v320_v0 }
  0x3e   :  { %229 = vmatpush3.bf16.msra.mxu0 %v228_v19 }
  0x3f   :  { %230 = vmatprep.subr.bf16.mxu0 %v320_v0 }
  0x42   :  { %232 = vmatpush3.bf16.msra.mxu0 %v231_v22 }
  0x43   :  { %233 = vmatprep.subr.bf16.mxu0 %v320_v0 }
  0x46   :  { %235 = vmatpush3.bf16.msra.mxu0 %v234_v25 }
  0x49   :  { %210 = vmatmul.mubr.f32.vlgmr.msra.gmra.mrb[0].mxu0 %v54_v26 }
 0x11c   :  { %v137_v28 = vpop.f32.mrb[0].mxu0 }
 0x11d   :  { %v141_v29 = vadd.f32 %v159_v27, %v137_v28  ;;  %v211_v30 = vpop.f32.mrb[1].mxu0 }
 0x11f   :  { %142 = vst [vmem:[#allocation7] sm:$0xff] %v141_v29 }
 0x120   :  { %299 = shalt.err (!%p296_p6)
}
 0x121   :  { %s300_s16 = scalar_lea.hbm %s393_s3, 128 }
 0x122   :  { %p301_p7 = scmp.ne.s32.totalorder %s393_s3, %s300_s16  ;;  %p304_p8 = scmp.lt.u32.totalorder %s300_s16, %s393_s3 }
 0x124   :  { %p306_p9 = pnand %p304_p8, %p301_p7 }
 0x126   :  { %309 = shalt.err (!%p306_p9)
}
 0x127   :  { %152 = dma.vmem_to_hbm [thread:$0]  %s150_s12, 128, %s393_s3, [#allocation4]  }
 0x128   :  { %314 = dma.done.wait [#allocation4], 128  }
 0x129   :  { %315 = vsyncadd [#allocation4], 4294967168 }
 0x12a   :  { %156 = vsyncpa [#allocation3], 1 }
 0x12b   :  { %157 = vsyncpa [#allocation6], 1 }
 0x12c   :  { %158 = vsyncpa [#allocation4], 1 }

</bundles_post_ra>
